<compile_context>
chip_gen: v7x
topology: tpu7x:2x2x1
jax: 0.10.0
libtpu: 0.0.40
codegen_flags: <defaults>
</compile_context>

<pallas_src>
import jax
import jax.numpy as jnp
from jax.experimental import pallas as pl
from jax.experimental.pallas import tpu as pltpu

_LANE = 128
_SUBLANE = 8


def _round_up(x, m):
    return ((x + m - 1) // m) * m


def network_fwd_kernel(x_ref, wband_ref, bconv_ref, wfc_ref, bfc_ref, out_ref):
    """conv3x3(same) -> bias -> ReLU -> global-avg-pool -> feat-fc -> cls-fc.

    x_ref    : (nb, H+2, (W+2)*Cin) bf16  spatially zero-padded input rows
    wband_ref: (3, (W+2)*Cin, W*Fp) bf16  banded conv weights, one per dy
    bconv_ref: (1, W*Fp)            f32   conv bias tiled over x
    wfc_ref  : (W*Fp, Cpad)         bf16  fused (feat-fc o cls-fc)/(H*W), tiled over x
    bfc_ref  : (1, Cpad)            f32   fused bias (bfeat @ wcls)
    out_ref  : (nb, Cpad)           f32   logits (lane-padded)
    """
    nb = x_ref.shape[0]
    h = x_ref.shape[1] - 2
    krow = x_ref.shape[2]
    wfp = wband_ref.shape[2]

    # Load the raw tile once; upcast to f32 so the row-shifted slices below are
    # plain 32-bit sublane relayouts (robust), then cast back to bf16 for MXU.
    xf = x_ref[...].astype(jnp.float32)                       # (nb, H+2, KROW)

    # 3x3 same-conv as 3 accumulated banded MXU matmuls.  Output row y of a
    # sample uses padded rows y, y+1, y+2, so the LHS for tap-row dy is the
    # rows [dy : dy+H] of the padded tile; the banded RHS places wconv[dy, dx]
    # at rows (x+dx)*Cin..+Cin and columns x*Fp..+F, producing the conv output
    # already in the lane-dense (y rows, x*Fp+f lanes) layout.
    acc = None
    for dy in range(3):
        lhs = xf[:, dy:dy + h, :].reshape(nb * h, krow).astype(jnp.bfloat16)
        part = jnp.dot(lhs, wband_ref[dy], preferred_element_type=jnp.float32)
        acc = part if acc is None else acc + part             # (nb*H, W*Fp) f32

    # Conv bias + ReLU on the small lane-dense f32 intermediate.
    acc = jnp.maximum(acc + bconv_ref[...], 0.0)

    # Global average pool: y-sum here (f32); the x-sum and 1/(H*W) scale are
    # folded into wfc (everything after the ReLU is linear, so this is exact).
    pooled = jnp.sum(acc.reshape(nb, h, wfp), axis=1)         # (nb, W*Fp) f32

    # Fused feature-fc + bias-free classifier-fc: one tiny MXU matmul + bias.
    logits = jnp.dot(pooled.astype(wfc_ref.dtype), wfc_ref[...],
                     preferred_element_type=jnp.float32) + bfc_ref[...]
    out_ref[...] = logits


def init_params(cin=4, conv_f=8, feat_dim=32, numclass=10):
    """Deterministic synthetic parameters (PyTorch weight layouts noted)."""
    k = jax.random.PRNGKey(42)
    k1, k2, k3, k4, k5 = jax.random.split(k, 5)
    # torch Conv2d weight is (F, Cin, 3, 3); stored here as (3, 3, Cin, F).
    wconv = jax.random.normal(k1, (3, 3, cin, conv_f), jnp.float32) * 0.1
    bconv = jax.random.normal(k2, (1, conv_f), jnp.float32) * 0.01
    # torch Linear weight is (out, in); stored transposed (in, out).
    wfeat = jax.random.normal(k3, (conv_f, feat_dim), jnp.float32) * 0.1
    bfeat = jax.random.normal(k4, (1, feat_dim), jnp.float32) * 0.01
    wcls = jax.random.normal(k5, (feat_dim, numclass), jnp.float32) * 0.1
    return dict(wconv=wconv, bconv=bconv, wfeat=wfeat, bfeat=bfeat, wcls=wcls)


def _choose_batch_tile(n):
    """Sublane-friendly batch tile; >=2 grid steps when the batch allows it."""
    n8 = _round_up(n, _SUBLANE)
    if n8 <= _SUBLANE:
        return _SUBLANE
    return min(256, max(_SUBLANE, _round_up(n8 // 2, _SUBLANE)))


def _prepare_inputs(x_nchw, nb):
    """NCHW -> (N_pad, H+2, (W+2)*Cin) bf16 spatially zero-padded row slabs."""
    x = jnp.transpose(x_nchw, (0, 2, 3, 1)).astype(jnp.float32)   # NHWC
    n, h, w, c = x.shape
    xpad = jnp.pad(x, ((0, 0), (1, 1), (1, 1), (0, 0)))
    xrows = xpad.reshape(n, h + 2, (w + 2) * c).astype(jnp.bfloat16)
    n_pad = _round_up(n, nb)
    if n_pad != n:
        xrows = jnp.pad(xrows, ((0, n_pad - n), (0, 0), (0, 0)))
    return xrows, n_pad, h, w, c


def _prepare_kernel_params(params, h, w, cin):
    """Banded conv weights + fused (pool o feat-fc o cls-fc) weights, lane-padded."""
    wconv = params["wconv"]                        # (3, 3, Cin, F)
    f = wconv.shape[3]
    numclass = params["wcls"].shape[1]

    # Pad F so W*Fp is a multiple of 128 when possible (W=16, F=8 -> exactly 128).
    fp = _round_up(f, _LANE // w) if _LANE % w == 0 else f
    wfp = w * fp
    cpad = _round_up(numclass, _LANE)
    krow = (w + 2) * cin

    # Banded conv weights: wband[dy, (x+dx)*Cin + c, x*Fp + f] = wconv[dy, dx, c, f].
    wconv_p = jnp.zeros((3, 3, cin, fp), jnp.float32).at[..., :f].set(wconv)
    p_idx = jnp.arange(w + 2)[None, :, None]
    x_idx = jnp.arange(w)[None, None, :]
    d_idx = jnp.arange(3)[:, None, None]
    ind = (p_idx == x_idx + d_idx).astype(jnp.float32)            # (3, W+2, W)
    wband = jnp.einsum("apx,eacf->epcxf", ind, wconv_p)           # (3,W+2,Cin,W,Fp)
    wband = wband.reshape(3, krow, wfp).astype(jnp.bfloat16)

    # Conv bias tiled over x on the lane dim.
    bconv_p = jnp.zeros((1, fp), jnp.float32).at[:, :f].set(params["bconv"])
    bconv_lane = jnp.tile(bconv_p, (1, w))                        # (1, W*Fp) f32

    # Exact fusion of feature-fc o classifier-fc; fold the 1/(H*W) pool scale
    # and the x-sum (tile over x) so the in-kernel pool is a plain y row-sum.
    wfc = (params["wfeat"] @ params["wcls"]) * (1.0 / float(h * w))  # (F, numclass)
    wfc_p = jnp.zeros((fp, cpad), jnp.float32).at[:f, :numclass].set(wfc)
    wfc_tiled = jnp.tile(wfc_p, (w, 1)).astype(jnp.bfloat16)      # (W*Fp, Cpad)
    bfc = jnp.zeros((1, cpad), jnp.float32).at[:, :numclass].set(
        params["bfeat"] @ params["wcls"])
    return wband, bconv_lane, wfc_tiled, bfc, numclass


def network_forward(x_nchw, params):
    """Equivalent of Network.forward(input): features -> bias-free classifier."""
    n = x_nchw.shape[0]
    nb = _choose_batch_tile(n)
    xrows, n_pad, h, w, cin = _prepare_inputs(x_nchw, nb)
    wband, bconv_lane, wfc_tiled, bfc, numclass = _prepare_kernel_params(
        params, h, w, cin)
    krow = xrows.shape[2]
    wfp = wband.shape[2]
    cpad = wfc_tiled.shape[1]
    grid = n_pad // nb

    out_padded = pl.pallas_call(
        network_fwd_kernel,
        out_shape=jax.ShapeDtypeStruct((n_pad, cpad), jnp.float32),
        grid_spec=pltpu.PrefetchScalarGridSpec(
            num_scalar_prefetch=0,
            grid=(grid,),
            in_specs=[
                pl.BlockSpec((nb, h + 2, krow), lambda i: (i, 0, 0)),  # raw input tile
                pl.BlockSpec((3, krow, wfp), lambda i: (0, 0, 0)),     # banded conv W
                pl.BlockSpec((1, wfp), lambda i: (0, 0)),              # conv bias
                pl.BlockSpec((wfp, cpad), lambda i: (0, 0)),           # fused fc W
                pl.BlockSpec((1, cpad), lambda i: (0, 0)),             # fused fc bias
            ],
            out_specs=pl.BlockSpec((nb, cpad), lambda i: (i, 0)),
        ),
        compiler_params=pltpu.CompilerParams(
            dimension_semantics=("parallel",),
            # Working set is < 8 MiB even at nb=256; 48 MB is safe on v5e/v6e
            # (128 MiB physical) and within v7x's 64 MiB.
            vmem_limit_bytes=48 * 1024 * 1024,
        ),
    )(xrows, wband, bconv_lane, wfc_tiled, bfc)

    return out_padded[:n, :numclass]


def network_forward_ref(x_nchw, params):
    """Pure-JAX f32 reference of the same forward pass (for a sanity check)."""
    x = jnp.transpose(x_nchw, (0, 2, 3, 1)).astype(jnp.float32)
    n, h, w, c = x.shape
    xpad = jnp.pad(x, ((0, 0), (1, 1), (1, 1), (0, 0)))
    f = params["wconv"].shape[-1]
    acc = jnp.zeros((n, h, w, f), jnp.float32)
    for dy in range(3):
        for dx in range(3):
            acc = acc + jnp.einsum("nhwc,cf->nhwf",
                                   xpad[:, dy:dy + h, dx:dx + w, :],
                                   params["wconv"][dy, dx])
    acc = jnp.maximum(acc + params["bconv"][0], 0.0)
    pooled = acc.mean(axis=(1, 2))
    feat = pooled @ params["wfeat"] + params["bfeat"]
    return feat @ params["wcls"]


# TODO(synk): `Incremental_learning` is training-time parameter surgery (row-wise
# weight copy/extension of self.fc), not part of the forward hot path; not a kernel.

if __name__ == "__main__":
    params = init_params(cin=4, conv_f=8, feat_dim=32, numclass=10)
    x = jax.random.normal(jax.random.PRNGKey(0), (2, 4, 16, 16), jnp.float32)

    out = network_forward(x, params)
    jax.block_until_ready(out)
    assert out.shape == (2, 10) and out.dtype == jnp.float32

    ref = network_forward_ref(x, params)
    err = float(jnp.max(jnp.abs(out - ref)))
    # bf16 MXU operands with f32 accumulation -> a few e-3 absolute error on
    # O(0.1) logits; tolerance tightened vs the previous version.
    assert jnp.allclose(out, ref, rtol=5e-2, atol=1e-2), f"max abs err {err}"

    # Exercise the batch-padding path and a multi-step grid (>=2 tiles so both
    # TensorCores get work on v7x).
    x2 = jax.random.normal(jax.random.PRNGKey(1), (19, 4, 16, 16), jnp.float32)
    out2 = network_forward(x2, params)
    jax.block_until_ready(out2)
    ref2 = network_forward_ref(x2, params)
    assert out2.shape == (19, 10)
    err2 = float(jnp.max(jnp.abs(out2 - ref2)))
    assert jnp.allclose(out2, ref2, rtol=5e-2, atol=1e-2), f"max abs err {err2}"

    print("KERNEL_OK")
</pallas_src>

<mosaic_0001>
module attributes {stable_mosaic.version = 11 : i64} {
  func.func @network_fwd_kernel(%arg0: i32, %arg1: memref<8x18x72xbf16, #tpu.memory_space<vmem>>, %arg2: memref<3x72x128xbf16, #tpu.memory_space<vmem>>, %arg3: memref<1x128xf32, #tpu.memory_space<vmem>>, %arg4: memref<128x128xbf16, #tpu.memory_space<vmem>>, %arg5: memref<1x128xf32, #tpu.memory_space<vmem>>, %arg6: memref<8x128xf32, #tpu.memory_space<vmem>>) attributes {dimension_semantics = [#tpu.dimension_semantics<parallel>], iteration_bounds = array<i64: 1>, scalar_prefetch = 0 : i64, scratch_operands = 0 : i64, tpu.core_type = #tpu.core_type<tc>, window_params = [{transform_indices = @transform_0, window_bounds = array<i64: 8, 18, 72>}, {pipeline_mode = #tpu.pipeline_mode<synchronous>, transform_indices = @transform_1, window_bounds = array<i64: 3, 72, 128>}, {pipeline_mode = #tpu.pipeline_mode<synchronous>, transform_indices = @transform_2, window_bounds = array<i64: 1, 128>}, {pipeline_mode = #tpu.pipeline_mode<synchronous>, transform_indices = @transform_3, window_bounds = array<i64: 128, 128>}, {pipeline_mode = #tpu.pipeline_mode<synchronous>, transform_indices = @transform_4, window_bounds = array<i64: 1, 128>}, {transform_indices = @transform_5, window_bounds = array<i64: 8, 128>}]} {
    %c0 = arith.constant 0 : index
    %c0_0 = arith.constant 0 : index
    %c0_1 = arith.constant 0 : index
    %0 = vector.load %arg1[%c0, %c0_0, %c0_1] : memref<8x18x72xbf16, #tpu.memory_space<vmem>>, vector<8x18x72xbf16>
    %1 = arith.extf %0 : vector<8x18x72xbf16> to vector<8x18x72xf32>
    %2 = vector.extract_strided_slice %1 {offsets = [0, 0, 0], sizes = [8, 16, 72], strides = [1, 1, 1]} : vector<8x18x72xf32> to vector<8x16x72xf32>
    %3 = vector.shape_cast %2 : vector<8x16x72xf32> to vector<128x72xf32>
    %4 = arith.truncf %3 : vector<128x72xf32> to vector<128x72xbf16>
    %c0_2 = arith.constant 0 : index
    %c0_3 = arith.constant 0 : index
    %c0_4 = arith.constant 0 : index
    %5 = vector.load %arg2[%c0_2, %c0_3, %c0_4] : memref<3x72x128xbf16, #tpu.memory_space<vmem>>, vector<1x72x128xbf16>
    %6 = vector.shape_cast %5 : vector<1x72x128xbf16> to vector<72x128xbf16>
    %cst = arith.constant dense<0.000000e+00> : vector<128x128xf32>
    %7 = tpu.matmul %4, %6, %cst {dimension_numbers = #tpu.dot_dimension_numbers<[1], [0], [0], [1], [0, 0, 1, 1], [], []>} : vector<128x72xbf16>, vector<72x128xbf16>, vector<128x128xf32> -> vector<128x128xf32>
    %8 = vector.extract_strided_slice %1 {offsets = [0, 1, 0], sizes = [8, 16, 72], strides = [1, 1, 1]} : vector<8x18x72xf32> to vector<8x16x72xf32>
    %9 = vector.shape_cast %8 : vector<8x16x72xf32> to vector<128x72xf32>
    %10 = arith.truncf %9 : vector<128x72xf32> to vector<128x72xbf16>
    %c1 = arith.constant 1 : index
    %c0_5 = arith.constant 0 : index
    %c0_6 = arith.constant 0 : index
    %11 = vector.load %arg2[%c1, %c0_5, %c0_6] : memref<3x72x128xbf16, #tpu.memory_space<vmem>>, vector<1x72x128xbf16>
    %12 = vector.shape_cast %11 : vector<1x72x128xbf16> to vector<72x128xbf16>
    %cst_7 = arith.constant dense<0.000000e+00> : vector<128x128xf32>
    %13 = tpu.matmul %10, %12, %cst_7 {dimension_numbers = #tpu.dot_dimension_numbers<[1], [0], [0], [1], [0, 0, 1, 1], [], []>} : vector<128x72xbf16>, vector<72x128xbf16>, vector<128x128xf32> -> vector<128x128xf32>
    %14 = arith.addf %7, %13 : vector<128x128xf32>
    %15 = vector.extract_strided_slice %1 {offsets = [0, 2, 0], sizes = [8, 16, 72], strides = [1, 1, 1]} : vector<8x18x72xf32> to vector<8x16x72xf32>
    %16 = vector.shape_cast %15 : vector<8x16x72xf32> to vector<128x72xf32>
    %17 = arith.truncf %16 : vector<128x72xf32> to vector<128x72xbf16>
    %c2 = arith.constant 2 : index
    %c0_8 = arith.constant 0 : index
    %c0_9 = arith.constant 0 : index
    %18 = vector.load %arg2[%c2, %c0_8, %c0_9] : memref<3x72x128xbf16, #tpu.memory_space<vmem>>, vector<1x72x128xbf16>
    %19 = vector.shape_cast %18 : vector<1x72x128xbf16> to vector<72x128xbf16>
    %cst_10 = arith.constant dense<0.000000e+00> : vector<128x128xf32>
    %20 = tpu.matmul %17, %19, %cst_10 {dimension_numbers = #tpu.dot_dimension_numbers<[1], [0], [0], [1], [0, 0, 1, 1], [], []>} : vector<128x72xbf16>, vector<72x128xbf16>, vector<128x128xf32> -> vector<128x128xf32>
    %21 = arith.addf %14, %20 : vector<128x128xf32>
    %c0_11 = arith.constant 0 : index
    %c0_12 = arith.constant 0 : index
    %22 = vector.load %arg3[%c0_11, %c0_12] : memref<1x128xf32, #tpu.memory_space<vmem>>, vector<1x128xf32>
    %23 = vector.broadcast %22 : vector<1x128xf32> to vector<128x128xf32>
    %24 = arith.addf %21, %23 : vector<128x128xf32>
    %cst_13 = arith.constant 0.000000e+00 : f32
    %25 = vector.broadcast %cst_13 : f32 to vector<128x128xf32>
    %26 = arith.maximumf %24, %25 : vector<128x128xf32>
    %27 = vector.shape_cast %26 : vector<128x128xf32> to vector<8x16x128xf32>
    %cst_14 = arith.constant dense<0.000000e+00> : vector<8x128xf32>
    %28 = vector.multi_reduction <add>, %27, %cst_14 [1] : vector<8x16x128xf32> to vector<8x128xf32>
    %29 = arith.truncf %28 : vector<8x128xf32> to vector<8x128xbf16>
    %c0_15 = arith.constant 0 : index
    %c0_16 = arith.constant 0 : index
    %30 = vector.load %arg4[%c0_15, %c0_16] : memref<128x128xbf16, #tpu.memory_space<vmem>>, vector<128x128xbf16>
    %cst_17 = arith.constant dense<0.000000e+00> : vector<8x128xf32>
    %31 = tpu.matmul %29, %30, %cst_17 {dimension_numbers = #tpu.dot_dimension_numbers<[1], [0], [0], [1], [0, 0, 1, 1], [], []>} : vector<8x128xbf16>, vector<128x128xbf16>, vector<8x128xf32> -> vector<8x128xf32>
    %c0_18 = arith.constant 0 : index
    %c0_19 = arith.constant 0 : index
    %32 = vector.load %arg5[%c0_18, %c0_19] : memref<1x128xf32, #tpu.memory_space<vmem>>, vector<1x128xf32>
    %33 = vector.broadcast %32 : vector<1x128xf32> to vector<8x128xf32>
    %34 = arith.addf %31, %33 : vector<8x128xf32>
    %c0_20 = arith.constant 0 : index
    %c0_21 = arith.constant 0 : index
    %35 = vector.load %arg6[%c0_20, %c0_21] : memref<8x128xf32, #tpu.memory_space<vmem>>, vector<8x128xf32>
    tpu.vector_store %arg6[%c0_20, %c0_21], %34 {strides = array<i32>} : memref<8x128xf32, #tpu.memory_space<vmem>>, vector<8x128xf32>,
    return
  }
  func.func @transform_0(%arg0: i32) -> (i32, i32, i32) {
    %c0_i32 = arith.constant 0 : i32
    %c0_i32_0 = arith.constant 0 : i32
    %c0_i32_1 = arith.constant 0 : i32
    return %arg0, %c0_i32, %c0_i32_0 : i32, i32, i32
  }
  func.func @transform_1(%arg0: i32) -> (i32, i32, i32) {
    %c0_i32 = arith.constant 0 : i32
    %c0_i32_0 = arith.constant 0 : i32
    %c0_i32_1 = arith.constant 0 : i32
    %c0_i32_2 = arith.constant 0 : i32
    return %c0_i32, %c0_i32_0, %c0_i32_1 : i32, i32, i32
  }
  func.func @transform_2(%arg0: i32) -> (i32, i32) {
    %c0_i32 = arith.constant 0 : i32
    %c0_i32_0 = arith.constant 0 : i32
    %c0_i32_1 = arith.constant 0 : i32
    return %c0_i32, %c0_i32_0 : i32, i32
  }
  func.func @transform_3(%arg0: i32) -> (i32, i32) {
    %c0_i32 = arith.constant 0 : i32
    %c0_i32_0 = arith.constant 0 : i32
    %c0_i32_1 = arith.constant 0 : i32
    return %c0_i32, %c0_i32_0 : i32, i32
  }
  func.func @transform_4(%arg0: i32) -> (i32, i32) {
    %c0_i32 = arith.constant 0 : i32
    %c0_i32_0 = arith.constant 0 : i32
    %c0_i32_1 = arith.constant 0 : i32
    return %c0_i32, %c0_i32_0 : i32, i32
  }
  func.func @transform_5(%arg0: i32) -> (i32, i32) {
    %c0_i32 = arith.constant 0 : i32
    %c0_i32_0 = arith.constant 0 : i32
    return %arg0, %c0_i32 : i32, i32
  }
}

</mosaic_0001>

<bundles_post_ra>
// kernel: tpu_custom_call.1
= control target key start
LH: loop header
LB: loop body
LE: loop exit
PB: predicated region body
PF: predicated region fallthrough
CT: control target
= control target key end

     0   :  { %vm213_vm0 = vcmask 588800   ;;  %vm238_vm1 = vcmask 1043456   ;;  %vm111_vm2 = vcmask 1046528   ;;  %s1727_s0 = inlined_call_operand.vmem [shape: bf16[8,18,72], index: 0, kind: input, shape index: {}]   ;;  %s1728_s1 = inlined_call_operand.vmem [shape: bf16[3,72,128], index: 1, kind: input, shape index: {}]   ;;  %s1729_s2 = inlined_call_operand.vmem [shape: f32[1,128], index: 2, kind: input, shape index: {}]   ;;  %s1730_s3 = inlined_call_operand.vmem [shape: bf16[128,128], index: 3, kind: input, shape index: {}]   ;;  %s1731_s4 = inlined_call_operand.vmem [shape: f32[1,128], index: 4, kind: input, shape index: {}]   ;;  %s1732_s5 = inlined_call_operand.hbm [shape: f32[8,128], index: 5, kind: output, shape index: {}]  }
   0x1   :  { %v1252_v0 = vld [vmem:[%s1728_s1] sm:$0xff]   ;;  %v1253_v1 = vld [vmem:[%s1728_s1 + $0x8] sm:$0xff]   ;;  %v1254_v2 = vld [vmem:[%s1728_s1 + $0x10] sm:$0xff]  }
   0x2   :  { %1142 = vmatprep.subr.bf16.mxu0 %v1252_v0  ;;  %v1360_v3 = vld [vmem:[%s1727_s0] sm:$0xff]   ;;  %v1255_v4 = vld [vmem:[%s1728_s1 + $0x18] sm:$0xff]   ;;  %v1265_v7 = vld [vmem:[%s1728_s1 + $0x2c] sm:$0xff]  }
   0x3   :  { %1143 = vmatpush3.bf16.msra.mxu0 %v1252_v0  ;;  %1152 = vmatprep.mubr.msk.bf16.mxu0 %vm213_vm0, %v1360_v3  ;;  %v1263_v5 = vld [vmem:[%s1728_s1 + $0x24] sm:$0xff]   ;;  %v1256_v6 = vld [vmem:[%s1728_s1 + $0x20] ss:$0 sps:$4 sm:$0xff]   ;;  %v46_v8 = vunpack.c.l.bf16 %v1360_v3  ;;  %v47_v9 = vunpack.c.h.bf16 %v1360_v3  ;;  %v1268_v10 = vld [vmem:[%s1728_s1 + $0x34] sm:$0xff]  }
   0x4   :  { %1144 = vmatprep.subr.bf16.mxu0 %v1253_v1  ;;  %1116 = vmatprep.subr.bf16.mxu1 %v1263_v5  ;;  %v1384_v11 = vld [vmem:[%s1727_s0 + $0xc] sm:$0xff]   ;;  %v391_v12 = vsel %vm238_vm1, %v1256_v6, 0  ;;  %v1395_v15 = vld [vmem:[%s1727_s0 + $0x18] sm:$0xff]   ;;  %v1410_v22 = vld [vmem:[%s1727_s0 + $0x24] sm:$0xff]  }
   0x5   :  { %1117 = vmatpush3.bf16.msra.mxu1 %v1263_v5  ;;  %v49_v13 = vunpack.c.l.bf16 %v1384_v11  ;;  %v1259_v14 = vld [vmem:[%s1728_s1 + $0x48] sm:$0xff]   ;;  %v50_v16 = vunpack.c.h.bf16 %v1384_v11  ;;  %v112_v17 = vrot.slane %v46_v8, 1  ;;  %v113_v18 = vrot.slane %v47_v9, 1  ;;  %v1270_v19 = vld [vmem:[%s1728_s1 + $0x3c] sm:$0xff]   ;;  %v1261_v24 = vld [vmem:[%s1728_s1 + $0x50] sm:$0xff]  }
   0x6   :  { %1118 = vmatprep.subr.bf16.mxu1 %v1265_v7  ;;  %v52_v20 = vunpack.c.l.bf16 %v1395_v15  ;;  %v53_v21 = vunpack.c.h.bf16 %v1395_v15  ;;  %v55_v25 = vunpack.c.l.bf16 %v1410_v22  ;;  %v1421_v26 = vld [vmem:[%s1727_s0 + $0x8] sm:$0x1]  ;;  %v1426_v27 = vld [vmem:[%s1727_s0 + $0x14] sm:$0x1]  ;;  %v1273_v30 = vld [vmem:[%s1728_s1 + $0x44] ss:$0 sps:$4 sm:$0xff]   ;;  %v56_v32 = vunpack.c.h.bf16 %v1410_v22 }
   0x7   :  { %1145 = vmatpush3.bf16.msra.mxu0 %v1253_v1  ;;  %v117_v23 = vrot.slane %v49_v13, 1  ;;  %v118_v28 = vrot.slane %v50_v16, 1  ;;  %v1433_v29 = vld [vmem:[%s1727_s0 + $0x30] sm:$0xff]   ;;  %v1441_v31 = vld [vmem:[%s1727_s0 + $0x20] sm:$0x1]  ;;  %v114_v34 = vsel %vm111_vm2, %v112_v17, %v113_v18  ;;  %v48_v38 = vunpack.c.l.bf16 %v1421_v26  ;;  %v1264_v42 = vld [vmem:[%s1728_s1 + $0x58] sm:$0xff]  }
   0x8   :  { %1146 = vmatprep.subr.bf16.mxu0 %v1254_v2  ;;  %v58_v33 = vunpack.c.l.bf16 %v1433_v29  ;;  %v1451_v35 = vld [vmem:[%s1727_s0 + $0x2c] sm:$0x1]  ;;  %v122_v36 = vrot.slane %v52_v20, 1  ;;  %v123_v37 = vrot.slane %v53_v21, 1  ;;  %v51_v39 = vunpack.c.l.bf16 %v1426_v27  ;;  %v1464_v40 = vld [vmem:[%s1727_s0 + $0x38] sm:$0x1] }
   0x9   :  { %1119 = vmatpush3.bf16.msra.mxu1 %v1265_v7  ;;  %v127_v41 = vrot.slane %v55_v25, 1  ;;  %v59_v43 = vunpack.c.h.bf16 %v1433_v29  ;;  %v54_v44 = vunpack.c.l.bf16 %v1441_v31  ;;  %v57_v45 = vunpack.c.l.bf16 %v1451_v35  ;;  %v1269_v52 = vld [vmem:[%s1728_s1 + $0x60] sm:$0xff]   ;;  %v1512_v1 = vld [vmem:[%s1727_s0 + $0x48] sm:$0xff]   ;;  %v1522_v5 = vld [vmem:[%s1727_s0 + $0x50] sm:$0x1] }
   0xa   :  { %1120 = vmatprep.subr.bf16.mxu1 %v1268_v10  ;;  %v240_v46 = vsel %vm238_vm1, %v1273_v30, 0  ;;  %v115_v47 = vrot.slane %v48_v38, 1  ;;  %v119_v48 = vsel %vm111_vm2, %v117_v23, %v118_v28  ;;  %v120_v49 = vrot.slane %v51_v39, 1  ;;  %v1492_v55 = vld [vmem:[%s1727_s0 + $0x3c] sm:$0xff]   ;;  %v1504_v63 = vld [vmem:[%s1727_s0 + $0x44] sm:$0x1] }
   0xb   :  { %1147 = vmatpush3.bf16.msra.mxu0 %v1254_v2  ;;  %v128_v50 = vrot.slane %v56_v32, 1  ;;  %v132_v51 = vrot.slane %v58_v33, 1  ;;  %v125_v53 = vrot.slane %v54_v44, 1  ;;  %v60_v54 = vunpack.c.l.bf16 %v1464_v40 }
   0xc   :  { %1148 = vmatprep.subr.bf16.mxu0 %v1255_v4  ;;  %v116_v56 = vsel %vm111_vm2, %v113_v18, %v115_v47  ;;  %v121_v57 = vsel %vm111_vm2, %v118_v28, %v120_v49  ;;  %v124_v58 = vsel %vm111_vm2, %v122_v36, %v123_v37  ;;  %v133_v59 = vrot.slane %v59_v43, 1 }
   0xd   :  { %1121 = vmatpush3.bf16.msra.mxu1 %v1268_v10  ;;  %v168_v60 = vpack.c.bf16 %v116_v56, %v114_v34  ;;  %v169_v61 = vpack.c.bf16 %v121_v57, %v119_v48  ;;  %v130_v62 = vrot.slane %v57_v45, 1  ;;  %v126_v0 = vsel %vm111_vm2, %v123_v37, %v125_v53  ;;  %v1274_v10 = vld [vmem:[%s1728_s1 + $0x68] ss:$0 sps:$4 sm:$0xff]  }
   0xe   :  { %1122 = vmatprep.subr.bf16.mxu1 %v1270_v19  ;;  %v170_v2 = vpack.c.bf16 %v126_v0, %v124_v58  ;;  %v62_v7 = vunpack.c.h.bf16 %v1492_v55 }
   0xf   :  { %1149 = vmatpush3.bf16.msra.mxu0 %v1255_v4  ;;  %1126 = vmatprep.mubr.msk.bf16.mxu1 %vm213_vm0, %v168_v60  ;;  %v135_v4 = vrot.slane %v60_v54, 1 }
  0x10   :  { %1247 = vmatprep.subr.msk.bf16.mxu0 %vm238_vm1, %v1256_v6  ;;  %v61_v6 = vunpack.c.l.bf16 %v1492_v55 }
  0x11   :  { %1123 = vmatpush3.bf16.msra.mxu1 %v1270_v19 }
  0x12   :  { %1246 = vmatprep.subr.msk.bf16.mxu1 %vm238_vm1, %v1273_v30 }
  0x13   :  { %1151 = vmatpush3.bf16.msra.mxu0 %v391_v12 }
  0x14   :  { %1168 = vmatprep.subr.bf16.mxu0 %v1259_v14 }
  0x15   :  { %1125 = vmatpush3.bf16.msra.mxu1 %v240_v46 }
  0x16   :  { %1153 = vmatmul.mubr.msk.bf16.vlgmr.msra.gmra.mrb[0].mxu0 %vm213_vm0, %v1384_v11 }
  0x17   :  { %1169 = vmatpush3.bf16.msra.mxu0 %v1259_v14  ;;  %1156 = vmatprep.mubr.msk.bf16.mxu0 %vm213_vm0, %v1395_v15 }
  0x18   :  { %1170 = vmatprep.subr.bf16.mxu0 %v1261_v24  ;;  %1127 = vmatmul.mubr.msk.bf16.vlgmr.msra.gmra.mrb[0].mxu1 %vm213_vm0, %v169_v61 }
  0x1b   :  { %1171 = vmatpush3.bf16.msra.mxu0 %v1261_v24 }
  0x1c   :  { %1172 = vmatprep.subr.bf16.mxu0 %v1264_v42 }
  0x1e   :  { %1157 = vmatmul.mubr.msk.bf16.gmra.mrb[4].mxu0 %vm213_vm0, %v1410_v22 }
  0x1f   :  { %1173 = vmatpush3.bf16.msra.mxu0 %v1264_v42  ;;  %1160 = vmatprep.mubr.msk.bf16.mxu0 %vm213_vm0, %v1433_v29 }
  0x20   :  { %1174 = vmatprep.subr.bf16.mxu0 %v1269_v52 }
  0x21   :  { %10 = vsyncpa [#allocation3], 0  ;;  %1130 = vmatprep.mubr.msk.bf16.mxu1 %vm213_vm0, %v170_v2  ;;  %v129_v12 = vsel %vm111_vm2, %v127_v41, %v128_v50  ;;  %v131_v14 = vsel %vm111_vm2, %v128_v50, %v130_v62  ;;  %v134_v17 = vsel %vm111_vm2, %v132_v51, %v133_v59  ;;  %v63_v18 = vunpack.c.l.bf16 %v1504_v63  ;;  %v1562_v47 = vld [vmem:[%s1727_s0 + $0x5c] sm:$0x1]  ;;  %v1569_v48 = vld [vmem:[%s1727_s0 + $0x54] sm:$0xff]   ;;  %s1317_s21 = smov [#allocation2]  }
  0x22   :  { %v64_v19 = vunpack.c.l.bf16 %v1512_v1  ;;  %v65_v23 = vunpack.c.h.bf16 %v1512_v1  ;;  %v136_v24 = vsel %vm111_vm2, %v133_v59, %v135_v4  ;;  %v66_v26 = vunpack.c.l.bf16 %v1522_v5  ;;  %s985_s22 = sshll.u32 %s1317_s21, 4  ;;  %s986_s22 = int_to_ptr.vmem [resolvable:$true] %s985_s22 }
  0x23   :  { %v491_v28 = vrot.slane %v46_v8, 2  ;;  %vm490_vm3 = vcmask 1045504   ;;  %1175 = vmatpush3.bf16.msra.mxu0 %v1269_v52  ;;  %v492_v30 = vrot.slane %v47_v9, 2  ;;  %v617_v34 = vsel %vm238_vm1, %v1274_v10, 0  ;;  %s1291_s23 = scalar_lea.vmem %s986_s22, 128  ;;  %p1296_p1 = scmp.lt.s32.totalorder %s986_s22, %s986_s22 }
  0x24   :  { %1248 = vmatprep.subr.msk.bf16.mxu0 %vm238_vm1, %v1274_v10  ;;  %v494_v36 = vrot.slane %v48_v38, 2  ;;  %v171_v37 = vpack.c.bf16 %v131_v14, %v129_v12  ;;  %v137_v41 = vrot.slane %v61_v6, 1  ;;  %v138_v42 = vrot.slane %v62_v7, 1  ;;  %p1292_p0 = scmp.ne.s32.totalorder %s986_s22, %s1291_s23  ;;  %p1297_p2 = scmp.lt.s32.totalorder %s1291_s23, %s1291_s23 }
  0x25   :  { %v172_v46 = vpack.c.bf16 %v136_v24, %v134_v17  ;;  %v140_v8 = vrot.slane %v63_v18, 1  ;;  %v142_v3 = vrot.slane %v64_v19, 1  ;;  %v143_v9 = vrot.slane %v65_v23, 1 }
  0x26   :  { %1161 = vmatmul.mubr.msk.bf16.gmra.mrb[8].mxu0 %vm213_vm0, %v1492_v55  ;;  %v145_v38 = vrot.slane %v66_v26, 1  ;;  %v67_v49 = vunpack.c.l.bf16 %v1569_v48  ;;  %v493_v50 = vsel %vm490_vm3, %v491_v28, %v492_v30  ;;  %v495_v51 = vsel %vm490_vm3, %v492_v30, %v494_v36  ;;  %1131 = vmatmul.mubr.msk.bf16.gmra.mrb[4].mxu1 %vm213_vm0, %v171_v37  ;;  %p1298_p3 = por %p1297_p2, %p1296_p1 }
  0x27   :  { %1164 = vmatprep.mubr.msk.bf16.mxu0 %vm213_vm0, %v1512_v1  ;;  %1177 = vmatpush3.bf16.msra.mxu0 %v617_v34  ;;  %v68_v52 = vunpack.c.h.bf16 %v1569_v48  ;;  %v139_v53 = vsel %vm111_vm2, %v137_v41, %v138_v42  ;;  %v141_v56 = vsel %vm111_vm2, %v138_v42, %v140_v8  ;;  %v69_v57 = vunpack.c.l.bf16 %v1562_v47  ;;  %v1276_v47 = vld [vmem:[%s1730_s3 + $0x8] sm:$0xff]  }
  0x28   :  { %1134 = vmatprep.mubr.msk.bf16.mxu1 %vm213_vm0, %v172_v46  ;;  %v144_v58 = vsel %vm111_vm2, %v142_v3, %v143_v9  ;;  %v146_v59 = vsel %vm111_vm2, %v143_v9, %v145_v38  ;;  %v496_v60 = vrot.slane %v49_v13, 2  ;;  %v497_v61 = vrot.slane %v50_v16, 2  ;;  %v1275_v9 = vld [vmem:[%s1730_s3] sm:$0xff]   ;;  %p1299_p4 = pnand %p1298_p3, %p1292_p0 }
  0x29   :  { %v499_v62 = vrot.slane %v51_v39, 2  ;;  %v547_v0 = vpack.c.bf16 %v495_v51, %v493_v50  ;;  %v501_v2 = vrot.slane %v52_v20, 2  ;;  %v502_v4 = vrot.slane %v53_v21, 2  ;;  %v1279_v50 = vld [vmem:[%s1730_s3 + $0x20] sm:$0xff]   ;;  %v1280_v51 = vld [vmem:[%s1730_s3 + $0x28] sm:$0xff]  }
  0x2a   :  { %v504_v10 = vrot.slane %v54_v44, 2  ;;  %v173_v12 = vpack.c.bf16 %v141_v56, %v139_v53  ;;  %v147_v13 = vrot.slane %v67_v49, 1  ;;  %v148_v14 = vrot.slane %v68_v52, 1  ;;  %v1282_v53 = vld [vmem:[%s1730_s3 + $0x38] sm:$0xff]  }
  0x2b   :  { %v174_v11 = vpack.c.bf16 %v146_v59, %v144_v58  ;;  %v150_v16 = vrot.slane %v69_v57, 1  ;;  %v498_v27 = vsel %vm490_vm3, %v496_v60, %v497_v61  ;;  %v500_v15 = vsel %vm490_vm3, %v497_v61, %v499_v62 }
  0x2c   :  { %v503_v20 = vsel %vm490_vm3, %v501_v2, %v502_v4  ;;  %v505_v21 = vsel %vm490_vm3, %v502_v4, %v504_v10  ;;  %v149_v31 = vsel %vm111_vm2, %v147_v13, %v148_v14  ;;  %v548_v44 = vpack.c.bf16 %v500_v15, %v498_v27 }
  0x2d   :  { %v151_v39 = vsel %vm111_vm2, %v148_v14, %v150_v16  ;;  %v506_v17 = vrot.slane %v55_v25, 2  ;;  %v507_v24 = vrot.slane %v56_v32, 2  ;;  %v549_v28 = vpack.c.bf16 %v505_v21, %v503_v20  ;;  %v1680_v14 = vld [vmem:[%s1729_s2] ss:$0 sm:$0xff] }
  0x2e   :  { %1165 = vmatmul.mubr.msk.bf16.gmra.mrb[12].mxu0 %vm213_vm0, %v1569_v48  ;;  %1135 = vmatmul.mubr.msk.bf16.gmra.mrb[8].mxu1 %vm213_vm0, %v173_v12  ;;  %v509_v30 = vrot.slane %v57_v45, 2  ;;  %v511_v34 = vrot.slane %v58_v33, 2  ;;  %v512_v36 = vrot.slane %v59_v43, 2  ;;  %v514_v37 = vrot.slane %v60_v54, 2  ;;  %v1277_v48 = vld [vmem:[%s1730_s3 + $0x10] sm:$0xff]  }
  0x2f   :  { %1178 = vmatprep.mubr.msk.bf16.mxu0 %vm213_vm0, %v547_v0  ;;  %1138 = vmatprep.mubr.msk.bf16.mxu1 %vm213_vm0, %v174_v11  ;;  %v175_v41 = vpack.c.bf16 %v151_v39, %v149_v31  ;;  %v508_v22 = vsel %vm490_vm3, %v506_v17, %v507_v24  ;;  %v516_v33 = vrot.slane %v61_v6, 2  ;;  %v517_v40 = vrot.slane %v62_v7, 2 }
  0x30   :  { %v510_v25 = vsel %vm490_vm3, %v507_v24, %v509_v30  ;;  %v513_v32 = vsel %vm490_vm3, %v511_v34, %v512_v36  ;;  %v515_v35 = vsel %vm490_vm3, %v512_v36, %v514_v37  ;;  %v519_v45 = vrot.slane %v63_v18, 2 }
  0x31   :  { %v550_v29 = vpack.c.bf16 %v510_v25, %v508_v22  ;;  %v551_v43 = vpack.c.bf16 %v515_v35, %v513_v32  ;;  %v521_v54 = vrot.slane %v64_v19, 2  ;;  %v522_v42 = vrot.slane %v65_v23, 2 }
  0x32   :  { %v524_v46 = vrot.slane %v66_v26, 2  ;;  %v518_v55 = vsel %vm490_vm3, %v516_v33, %v517_v40  ;;  %v520_v6 = vsel %vm490_vm3, %v517_v40, %v519_v45  ;;  %v526_v1 = vrot.slane %v67_v49, 2  ;;  %v1278_v49 = vld [vmem:[%s1730_s3 + $0x18] sm:$0xff]  }
  0x33   :  { %v523_v63 = vsel %vm490_vm3, %v521_v54, %v522_v42  ;;  %v552_v18 = vpack.c.bf16 %v520_v6, %v518_v55  ;;  %v527_v19 = vrot.slane %v68_v52, 2  ;;  %v529_v5 = vrot.slane %v69_v57, 2  ;;  %v1281_v52 = vld [vmem:[%s1730_s3 + $0x30] sm:$0xff]  }
  0x34   :  { %v525_v7 = vsel %vm490_vm3, %v522_v42, %v524_v46  ;;  %v1315_v38 = vmov 0.0   ;;  %vm1316_vm4 = vmmov 0   ;;  %vm874_vm5 = vcmask 1041409  }
  0x35   :  { %v553_v23 = vpack.c.bf16 %v525_v7, %v523_v63  ;;  %v528_v26 = vsel %vm490_vm3, %v526_v1, %v527_v19  ;;  %v530_v8 = vsel %vm490_vm3, %v527_v19, %v529_v5  ;;  %1194 = vmatprep.subr.bf16.mxu1 %v1315_v38  ;;  %vm876_vm6 = vcmask 1042434  }
  0x36   :  { %1179 = vmatmul.mubr.msk.bf16.vlgmr.msra.gmra.mrb[0].mxu0 %vm213_vm0, %v548_v44  ;;  %1139 = vmatmul.mubr.msk.bf16.gmra.mrb[12].mxu1 %vm213_vm0, %v175_v41  ;;  %v554_v3 = vpack.c.bf16 %v530_v8, %v528_v26  ;;  %vm878_vm7 = vcmask 1043459   ;;  %vm880_vm8 = vcmask 1044484   ;;  %vm882_vm9 = vcmask 1045509  }
  0x37   :  { %1182 = vmatprep.mubr.msk.bf16.mxu0 %vm213_vm0, %v549_v28  ;;  %1195 = vmatpush3.bf16.msra.mxu1 %v1275_v9  ;;  %vm884_vm10 = vcmask 1046534   ;;  %vm886_vm11 = vcmask 1047559  }
  0x38   :  { %1196 = vmatprep.subr.bf16.mxu1 %v1315_v38  ;;  %1210 = vmatprep.mubr.msk.bf16.mxu1 %vm1316_vm4, %v1315_v38 }
  0x3b   :  { %1197 = vmatpush3.bf16.msra.mxu1 %v1276_v47 }
  0x3c   :  { %1198 = vmatprep.subr.bf16.mxu1 %v1315_v38 }
  0x3e   :  { %1183 = vmatmul.mubr.msk.bf16.gmra.mrb[4].mxu0 %vm213_vm0, %v550_v29 }
  0x3f   :  { %1186 = vmatprep.mubr.msk.bf16.mxu0 %vm213_vm0, %v551_v43  ;;  %1199 = vmatpush3.bf16.msra.mxu1 %v1277_v48 }
  0x40   :  { %1200 = vmatprep.subr.bf16.mxu1 %v1315_v38 }
  0x43   :  { %1201 = vmatpush3.bf16.msra.mxu1 %v1278_v49 }
  0x44   :  { %1202 = vmatprep.subr.bf16.mxu1 %v1315_v38 }
  0x46   :  { %1187 = vmatmul.mubr.msk.bf16.gmra.mrb[8].mxu0 %vm213_vm0, %v552_v18 }
  0x47   :  { %1190 = vmatprep.mubr.msk.bf16.mxu0 %vm213_vm0, %v553_v23  ;;  %1203 = vmatpush3.bf16.msra.mxu1 %v1279_v50 }
  0x48   :  { %1204 = vmatprep.subr.bf16.mxu1 %v1315_v38 }
  0x4b   :  { %1205 = vmatpush3.bf16.msra.mxu1 %v1280_v51 }
  0x4c   :  { %1206 = vmatprep.subr.bf16.mxu1 %v1315_v38 }
  0x4e   :  { %1191 = vmatmul.mubr.msk.bf16.gmra.mrb[12].mxu0 %vm213_vm0, %v554_v3 }
  0x4f   :  { %1207 = vmatpush3.bf16.msra.mxu1 %v1281_v52 }
  0x50   :  { %1208 = vmatprep.subr.bf16.mxu1 %v1315_v38 }
  0x53   :  { %1209 = vmatpush3.bf16.msra.mxu1 %v1282_v53 }
  0xeb   :  { %v1128_v56 = vpop.f32.mrb[0].mxu1 }
  0xec   :  { %v276_v57 = vpop.f32.mrb[1].mxu1 }
  0xed   :  { %v1129_v58 = vpop.f32.mrb[2].mxu1 }
  0xee   :  { %v279_v59 = vpop.f32.mrb[3].mxu1 }
  0xf9   :  { %v1132_v60 = vpop.f32.mrb[4].mxu1 }
  0xfa   :  { %v292_v61 = vpop.f32.mrb[5].mxu1 }
  0xfb   :  { %v1133_v62 = vpop.f32.mrb[6].mxu1 }
  0xfc   :  { %v295_v0 = vpop.f32.mrb[7].mxu1 }
 0x101   :  { %v1136_v2 = vpop.f32.mrb[8].mxu1 }
 0x102   :  { %v308_v4 = vpop.f32.mrb[9].mxu1 }
 0x103   :  { %v1137_v10 = vpop.f32.mrb[10].mxu1 }
 0x104   :  { %v1675_v12 = vpop.f32.mrb[11].mxu1 }
 0x109   :  { %v1180_v13 = vpop.f32.mrb[0].mxu0  ;;  %v1682_v20 = vpop.f32.mrb[12].mxu1 }
 0x10a   :  { %v1214_v11 = vadd.f32 %v1180_v13, %v1128_v56  ;;  %v653_v16 = vpop.f32.mrb[1].mxu0  ;;  %v1685_v44 = vpop.f32.mrb[13].mxu1 }
 0x10b   :  { %v1215_v27 = vadd.f32 %v653_v16, %v276_v57  ;;  %v1181_v15 = vpop.f32.mrb[2].mxu0  ;;  %v1688_v28 = vpop.f32.mrb[14].mxu1 }
 0x10c   :  { %v741_v21 = vadd.f32 %v1214_v11, %v1680_v14  ;;  %v1216_v31 = vadd.f32 %v1181_v15, %v1129_v58  ;;  %v656_v39 = vpop.f32.mrb[3].mxu0  ;;  %v1691_v34 = vpop.f32.mrb[15].mxu1 }
 0x10d   :  { %v739_v17 = vadd.f32 %v1215_v27, %v1680_v14  ;;  %v1217_v24 = vadd.f32 %v656_v39, %v279_v59 }
 0x10e   :  { %v742_v30 = vadd.f32 %v1216_v31, %v1680_v14  ;;  %v757_v37 = vmax.f32 %v741_v21, 0.0 }
 0x10f   :  { %v740_v36 = vadd.f32 %v1217_v24, %v1680_v14  ;;  %v755_v22 = vmax.f32 %v739_v17, 0.0 }
 0x110   :  { %v758_v41 = vmax.f32 %v742_v30, 0.0 }
 0x111   :  { %v756_v25 = vmax.f32 %v740_v36, 0.0  ;;  %v1184_v32 = vpop.f32.mrb[4].mxu0 }
 0x112   :  { %v778_v35 = vadd.f32 %v758_v41, %v757_v37  ;;  %v1218_v29 = vadd.f32 %v1184_v32, %v1132_v60  ;;  %v669_v33 = vpop.f32.mrb[5].mxu0 }
 0x113   :  { %v771_v40 = vadd.f32 %v756_v25, %v755_v22  ;;  %v1219_v43 = vadd.f32 %v669_v33, %v292_v61  ;;  %v1185_v45 = vpop.f32.mrb[6].mxu0 }
 0x114   :  { %v779_v54 = vrot.slane %v778_v35, 4  ;;  %v745_v42 = vadd.f32 %v1218_v29, %v1680_v14  ;;  %v1220_v46 = vadd.f32 %v1185_v45, %v1133_v62  ;;  %v672_v55 = vpop.f32.mrb[7].mxu0 }
 0x115   :  { %v772_v6 = vrot.slane %v771_v40, 4  ;;  %v743_v63 = vadd.f32 %v1219_v43, %v1680_v14  ;;  %v1221_v7 = vadd.f32 %v672_v55, %v295_v0 }
 0x116   :  { %v780_v18 = vadd.f32 %v779_v54, %v778_v35  ;;  %v746_v1 = vadd.f32 %v1220_v46, %v1680_v14  ;;  %v761_v26 = vmax.f32 %v745_v42, 0.0 }
 0x117   :  { %v773_v19 = vadd.f32 %v772_v6, %v771_v40  ;;  %v744_v23 = vadd.f32 %v1221_v7, %v1680_v14  ;;  %v759_v9 = vmax.f32 %v743_v63, 0.0 }
 0x118   :  { %v781_v5 = vrot.slane %v780_v18, 2  ;;  %v762_v8 = vmax.f32 %v746_v1, 0.0 }
 0x119   :  { %v774_v3 = vrot.slane %v773_v19, 2  ;;  %v760_v38 = vmax.f32 %v744_v23, 0.0  ;;  %v1188_v47 = vpop.f32.mrb[8].mxu0 }
 0x11a   :  { %v782_v48 = vadd.f32 %v781_v5, %v780_v18  ;;  %v792_v49 = vadd.f32 %v762_v8, %v761_v26  ;;  %v1222_v50 = vadd.f32 %v1188_v47, %v1136_v2  ;;  %v685_v51 = vpop.f32.mrb[9].mxu0 }
 0x11b   :  { %v775_v52 = vadd.f32 %v774_v3, %v773_v19  ;;  %v785_v53 = vadd.f32 %v760_v38, %v759_v9  ;;  %v1223_v56 = vadd.f32 %v685_v51, %v308_v4  ;;  %v1189_v57 = vpop.f32.mrb[10].mxu0 }
 0x11c   :  { %v783_v58 = vrot.slane %v782_v48, 1  ;;  %v793_v59 = vrot.slane %v792_v49, 4  ;;  %v749_v60 = vadd.f32 %v1222_v50, %v1680_v14  ;;  %v1224_v61 = vadd.f32 %v1189_v57, %v1137_v10  ;;  %v688_v62 = vpop.f32.mrb[11].mxu0 }
 0x11d   :  { %v776_v0 = vrot.slane %v775_v52, 1  ;;  %v786_v13 = vrot.slane %v785_v53, 4  ;;  %v747_v11 = vadd.f32 %v1223_v56, %v1680_v14  ;;  %v1225_v16 = vadd.f32 %v688_v62, %v1675_v12 }
 0x11e   :  { %v784_v27 = vadd.f32 %v783_v58, %v782_v48  ;;  %v794_v15 = vadd.f32 %v793_v59, %v792_v49  ;;  %v750_v2 = vadd.f32 %v1224_v61, %v1680_v14  ;;  %v765_v24 = vmax.f32 %v749_v60, 0.0 }
 0x11f   :  { %v777_v21 = vadd.f32 %v776_v0, %v775_v52  ;;  %v787_v4 = vadd.f32 %v786_v13, %v785_v53  ;;  %v748_v31 = vadd.f32 %v1225_v16, %v1680_v14  ;;  %v763_v37 = vmax.f32 %v747_v11, 0.0 }
 0x120   :  { %v828_v39 = vpack.c.bf16 %v784_v27, %v784_v27  ;;  %v795_v17 = vrot.slane %v794_v15, 2  ;;  %v766_v10 = vmax.f32 %v750_v2, 0.0 }
 0x121   :  { %v827_v30 = vpack.c.bf16 %v777_v21, %v777_v21  ;;  %v788_v36 = vrot.slane %v787_v4, 2  ;;  %v764_v41 = vmax.f32 %v748_v31, 0.0  ;;  %v1192_v22 = vpop.f32.mrb[12].mxu0 }
 0x122   :  { %v867_v25 = vunpack.c.l.b16 %v828_v39  ;;  %v796_v12 = vadd.f32 %v795_v17, %v794_v15  ;;  %v806_v32 = vadd.f32 %v766_v10, %v765_v24  ;;  %v1226_v35 = vadd.f32 %v1192_v22, %v1682_v20  ;;  %v701_v29 = vpop.f32.mrb[13].mxu0 }
 0x123   :  { %v866_v33 = vunpack.c.l.b16 %v827_v30  ;;  %v789_v40 = vadd.f32 %v788_v36, %v787_v4  ;;  %v799_v43 = vadd.f32 %v764_v41, %v763_v37  ;;  %v1227_v45 = vadd.f32 %v701_v29, %v1685_v44  ;;  %v1193_v54 = vpop.f32.mrb[14].mxu0 }
 0x124   :  { %v797_v42 = vrot.slane %v796_v12, 1  ;;  %v807_v46 = vrot.slane %v806_v32, 4  ;;  %v753_v55 = vadd.f32 %v1226_v35, %v1680_v14  ;;  %v1228_v6 = vadd.f32 %v1193_v54, %v1688_v28  ;;  %v704_v63 = vpop.f32.mrb[15].mxu0 }
 0x125   :  { %v875_v7 = vsel %vm874_vm5, %v867_v25, %v866_v33  ;;  %v790_v18 = vrot.slane %v789_v40, 1  ;;  %v800_v1 = vrot.slane %v799_v43, 4  ;;  %v751_v44 = vadd.f32 %v1227_v45, %v1680_v14 }
 0x126   :  { %v798_v19 = vadd.f32 %v797_v42, %v796_v12  ;;  %v808_v20 = vadd.f32 %v807_v46, %v806_v32  ;;  %v754_v23 = vadd.f32 %v1228_v6, %v1680_v14  ;;  %v1229_v8 = vadd.f32 %v704_v63, %v1691_v34 }
 0x127   :  { %v791_v5 = vadd.f32 %v790_v18, %v789_v40  ;;  %v801_v26 = vadd.f32 %v800_v1, %v799_v43  ;;  %v769_v38 = vmax.f32 %v753_v55, 0.0  ;;  %v767_v56 = vmax.f32 %v751_v44, 0.0  ;;  %v1059_v43 = vld [vmem:[%s1731_s4] ss:$0 sm:$0xff] }
 0x128   :  { %v830_v3 = vpack.c.bf16 %v798_v19, %v798_v19  ;;  %v809_v9 = vrot.slane %v808_v20, 2  ;;  %v770_v47 = vmax.f32 %v754_v23, 0.0  ;;  %v752_v49 = vadd.f32 %v1229_v8, %v1680_v14 }
 0x129   :  { %v829_v28 = vpack.c.bf16 %v791_v5, %v791_v5  ;;  %v802_v48 = vrot.slane %v801_v26, 2 }
 0x12a   :  { %v810_v50 = vadd.f32 %v809_v9, %v808_v20  ;;  %v820_v51 = vadd.f32 %v770_v47, %v769_v38  ;;  %v768_v57 = vmax.f32 %v752_v49, 0.0  ;;  %v869_v58 = vunpack.c.l.b16 %v830_v3 }
 0x12b   :  { %v868_v52 = vunpack.c.l.b16 %v829_v28  ;;  %v803_v53 = vadd.f32 %v802_v48, %v801_v26 }
 0x12c   :  { %v811_v59 = vrot.slane %v810_v50, 1  ;;  %v821_v60 = vrot.slane %v820_v51, 4  ;;  %v813_v62 = vadd.f32 %v768_v57, %v767_v56 }
 0x12d   :  { %v877_v34 = vsel %vm876_vm6, %v868_v52, %v875_v7  ;;  %v804_v61 = vrot.slane %v803_v53, 1 }
 0x12e   :  { %v812_v0 = vadd.f32 %v811_v59, %v810_v50  ;;  %v879_v13 = vsel %vm878_vm7, %v869_v58, %v877_v34  ;;  %v822_v11 = vadd.f32 %v821_v60, %v820_v51  ;;  %v814_v27 = vrot.slane %v813_v62, 4 }
 0x12f   :  { %v805_v16 = vadd.f32 %v804_v61, %v803_v53 }
 0x130   :  { %v832_v14 = vpack.c.bf16 %v812_v0, %v812_v0  ;;  %v823_v15 = vrot.slane %v822_v11, 2  ;;  %v815_v21 = vadd.f32 %v814_v27, %v813_v62 }
 0x131   :  { %v831_v2 = vpack.c.bf16 %v805_v16, %v805_v16 }
 0x132   :  { %v824_v4 = vadd.f32 %v823_v15, %v822_v11  ;;  %v816_v39 = vrot.slane %v815_v21, 2  ;;  %v871_v17 = vunpack.c.l.b16 %v832_v14 }
 0x133   :  { %v870_v31 = vunpack.c.l.b16 %v831_v2 }
 0x134   :  { %v825_v24 = vrot.slane %v824_v4, 1  ;;  %v817_v30 = vadd.f32 %v816_v39, %v815_v21 }
 0x135   :  { %v881_v10 = vsel %vm880_vm8, %v870_v31, %v879_v13 }
 0x136   :  { %v826_v36 = vadd.f32 %v825_v24, %v824_v4  ;;  %v883_v37 = vsel %vm882_vm9, %v871_v17, %v881_v10  ;;  %v818_v41 = vrot.slane %v817_v30, 1 }
 0x138   :  { %v819_v22 = vadd.f32 %v818_v41, %v817_v30  ;;  %v834_v25 = vpack.c.bf16 %v826_v36, %v826_v36 }
 0x13a   :  { %v833_v12 = vpack.c.bf16 %v819_v22, %v819_v22  ;;  %v873_v35 = vunpack.c.l.b16 %v834_v25 }
 0x13c   :  { %v872_v32 = vunpack.c.l.b16 %v833_v12 }
 0x13e   :  { %v885_v29 = vsel %vm884_vm10, %v872_v32, %v883_v37 }
 0x13f   :  { %v887_v33 = vsel %vm886_vm11, %v873_v35, %v885_v29 }
 0x140   :  { %v888_v40 = vpack.c.b16 %v887_v33, %v887_v33 }
 0x142   :  { %1211 = vmatmul.mubr.bf16.vlgmr.msra.gmra.mrb[16].mxu1 %v888_v40 }
 0x215   :  { %v972_v45 = vpop.f32.mrb[16].mxu1 }
 0x216   :  { %v973_v54 = vadd.f32 %v1059_v43, %v972_v45  ;;  %v1212_v42 = vpop.f32.mrb[17].mxu1 }
 0x217   :  { %v975_v46 = vpop.f32.mrb[18].mxu1 }
 0x218   :  { %978 = vst [vmem:[#allocation2] sm:$0xff] %v973_v54  ;;  %v1213_v55 = vpop.f32.mrb[19].mxu1 }
 0x219   :  { %1302 = shalt.err (!%p1299_p4)
}
 0x21a   :  { %s1303_s4 = scalar_lea.hbm %s1732_s5, 128 }
 0x21b   :  { %p1304_p5 = scmp.ne.s32.totalorder %s1732_s5, %s1303_s4  ;;  %p1307_p6 = scmp.lt.u32.totalorder %s1303_s4, %s1732_s5 }
 0x21d   :  { %p1309_p7 = pnand %p1307_p6, %p1304_p5 }
 0x21f   :  { %1312 = shalt.err (!%p1309_p7)
}
 0x220   :  { %988 = dma.vmem_to_hbm [thread:$0]  %s986_s22, 128, %s1732_s5, [#allocation3]  }
 0x221   :  { %1313 = dma.done.wait [#allocation3], 128  }
 0x222   :  { %1314 = vsyncadd [#allocation3], 4294967168 }
 0x223   :  { %992 = vsyncpa [#allocation3], 1 }

</bundles_post_ra>
